<compile_context>
chip_gen: v6e
topology: v6e:2x2x1
jax: 0.10.0
libtpu: 0.0.40
codegen_flags: <defaults>
</compile_context>

<pallas_src>
import numpy as np
import jax
import jax.numpy as jnp
from jax.experimental import pallas as pl
from jax.experimental.pallas import tpu as pltpu


def _round_up(x, m):
    return ((x + m - 1) // m) * m


def _logit_adjust_nll_kernel(logits_ref, adjust_ref, tgt_val_ref, nll_ref):
    """Per-row NLL of the logit-adjusted softmax.

    logits_ref : (TB, Cp) caller dtype   -- batch tile of raw logits
    adjust_ref : (1,  Cp) f32            -- tau * log(prior + 1e-12), 0 in pad lanes
    tgt_val_ref: (TB, 1)  f32            -- logits[i, t_i] + adjust[t_i] (pre-gathered)
    nll_ref    : (TB, 1)  f32            -- output: lse_i - adjusted target logit
    """
    adj = logits_ref[...].astype(jnp.float32) + adjust_ref[...]       # (TB, Cp)
    m = jnp.max(adj, axis=-1, keepdims=True)                          # (TB, 1)
    lse = jnp.log(jnp.sum(jnp.exp(adj - m), axis=-1, keepdims=True)) + m
    nll_ref[...] = lse - tgt_val_ref[...]                             # (TB, 1)


def logit_adjust_loss(output_logits, target, m_list=None, tau=1.0,
                      per_cls_weights=None, block_b=None):
    """Forward pass of LogitAdjustLoss.

    output_logits: [B, C] float (f32 or bf16 -- passed through to the kernel)
    target       : [B]    int
    m_list       : [C] normalized class priors (None -> plain cross entropy)
    per_cls_weights: optional [C] f32 class weights (reweight_epoch path)
    """
    B, C = output_logits.shape
    tgt = target.astype(jnp.int32)

    # adjust_term = tau * log(prior + 1e-12)  (detached constant; 0 if no prior)
    if m_list is None:
        adjust = jnp.zeros((C,), jnp.float32)
    else:
        adjust = jnp.log(m_list.astype(jnp.float32) + 1e-12) * tau

    # Wrapper-side O(B) gathers: adjusted target logit and per-sample weight.
    tgt_logit = jnp.take_along_axis(
        output_logits.astype(jnp.float32), tgt[:, None], axis=-1)     # (B, 1)
    tgt_val = tgt_logit + adjust[tgt][:, None]                        # (B, 1)
    if per_cls_weights is None:
        w = jnp.ones((B,), jnp.float32)
    else:
        w = per_cls_weights.astype(jnp.float32)[tgt]                  # (B,)

    # ---- lane / sublane padding and batch-tile choice --------------------
    Cp = _round_up(max(C, 128), 128)
    itemsize = np.dtype(output_logits.dtype).itemsize
    if block_b is None:
        # keep one logits tile <= ~4 MiB so 2x double-buffer fits every
        # generation's default scoped VMEM (v5e 16 MiB, v6e/v7x 32 MiB).
        tb = max(8, min(256, (4 * 1024 * 1024) // (Cp * itemsize)))
        tb = max(8, (tb // 8) * 8)
    else:
        tb = _round_up(block_b, 8)
    Bp = _round_up(B, tb)

    # Pad classes with a large-negative value (exp -> 0), batch rows with 0.
    logits_p = jnp.pad(output_logits, ((0, 0), (0, Cp - C)),
                       constant_values=-1e30)
    logits_p = jnp.pad(logits_p, ((0, Bp - B), (0, 0)))
    adjust_p = jnp.pad(adjust, (0, Cp - C)).reshape(1, Cp)
    tgt_val_p = jnp.pad(tgt_val, ((0, Bp - B), (0, 0)))

    grid = (Bp // tb,)
    nll_p = pl.pallas_call(
        _logit_adjust_nll_kernel,
        out_shape=jax.ShapeDtypeStruct((Bp, 1), jnp.float32),
        grid=grid,
        in_specs=[
            pl.BlockSpec((tb, Cp), lambda i: (i, 0)),   # logits batch tile
            pl.BlockSpec((1, Cp), lambda i: (0, 0)),    # adjust vector (resident)
            pl.BlockSpec((tb, 1), lambda i: (i, 0)),    # adjusted target logit
        ],
        out_specs=pl.BlockSpec((tb, 1), lambda i: (i, 0)),
        compiler_params=pltpu.CompilerParams(
            dimension_semantics=("parallel",),          # shard tiles over TCs (v7x)
            vmem_limit_bytes=32 * 1024 * 1024,
        ),
    )(logits_p, adjust_p, tgt_val_p)

    nll = nll_p[:B, 0]                                   # drop padded rows
    # F.cross_entropy(..., weight=w, reduction='mean') semantics.
    return jnp.sum(w * nll) / jnp.sum(w)


def _reference(output_logits, target, m_list=None, tau=1.0, per_cls_weights=None):
    """Pure-JAX reference mirroring the PyTorch forward."""
    x = output_logits.astype(jnp.float32)
    if m_list is not None:
        x = x + (jnp.log(m_list.astype(jnp.float32) + 1e-12) * tau)[None, :]
    logprobs = jax.nn.log_softmax(x, axis=-1)
    nll = -jnp.take_along_axis(logprobs, target[:, None], axis=-1)[:, 0]
    if per_cls_weights is None:
        return jnp.mean(nll)
    w = per_cls_weights.astype(jnp.float32)[target]
    return jnp.sum(w * nll) / jnp.sum(w)


# TODO(synk): `_hook_before_epoch` / `.to(device)` epoch-dependent state handling is
# host-side training logic with no kernel equivalent; the weighted path is exposed
# via the `per_cls_weights` argument instead.

if __name__ == "__main__":
    B, C = 8, 16
    tau = 1.0

    # Deterministic synthetic long-tailed class counts (C classes).
    cls_num_list = [int(1000 * (0.7 ** i)) + 5 for i in range(C)]
    cls_np = np.asarray(cls_num_list, dtype=np.float64)

    # m_list: normalized class priors (as in the PyTorch __init__).
    m_list = jnp.asarray(cls_np / cls_np.sum(), dtype=jnp.float32)

    # per-class weights from the reweight_epoch != -1 branch (effective number).
    beta = 0.9999
    eff = 1.0 - np.power(beta, cls_np)
    w_np = (1.0 - beta) / eff
    w_np = w_np / w_np.sum() * len(cls_num_list)
    per_cls_weights = jnp.asarray(w_np, dtype=jnp.float32)

    key = jax.random.PRNGKey(0)
    k1, k2 = jax.random.split(key)
    logits = jax.random.normal(k1, (B, C), dtype=jnp.float32)
    target = jax.random.randint(k2, (B,), 0, C, dtype=jnp.int32)

    # Unweighted path (reweight_epoch == -1 -> weight=None).
    loss = jax.block_until_ready(logit_adjust_loss(logits, target, m_list, tau))
    ref = jax.block_until_ready(_reference(logits, target, m_list, tau))
    assert jnp.allclose(loss, ref, rtol=1e-5, atol=1e-5), (loss, ref)

    # Weighted path (epoch > reweight_epoch -> per_cls_weights enabled).
    loss_w = jax.block_until_ready(
        logit_adjust_loss(logits, target, m_list, tau, per_cls_weights))
    ref_w = jax.block_until_ready(
        _reference(logits, target, m_list, tau, per_cls_weights))
    assert jnp.allclose(loss_w, ref_w, rtol=1e-5, atol=1e-5), (loss_w, ref_w)

    print("KERNEL_OK")
</pallas_src>

<mosaic_0001>
module attributes {stable_mosaic.version = 11 : i64} {
  func.func @_logit_adjust_nll_kernel(%arg0: i32, %arg1: memref<256x128xf32, #tpu.memory_space<vmem>>, %arg2: memref<1x128xf32, #tpu.memory_space<vmem>>, %arg3: memref<256x1xf32, #tpu.memory_space<vmem>>, %arg4: memref<256x1xf32, #tpu.memory_space<vmem>>) attributes {dimension_semantics = [#tpu.dimension_semantics<parallel>], iteration_bounds = array<i64: 1>, scalar_prefetch = 0 : i64, scratch_operands = 0 : i64, tpu.core_type = #tpu.core_type<tc>, window_params = [{transform_indices = @transform_0, window_bounds = array<i64: 256, 128>}, {pipeline_mode = #tpu.pipeline_mode<synchronous>, transform_indices = @transform_1, window_bounds = array<i64: 1, 128>}, {transform_indices = @transform_2, window_bounds = array<i64: 256, 1>}, {transform_indices = @transform_3, window_bounds = array<i64: 256, 1>}]} {
    %c0 = arith.constant 0 : index
    %c0_0 = arith.constant 0 : index
    %0 = vector.load %arg1[%c0, %c0_0] : memref<256x128xf32, #tpu.memory_space<vmem>>, vector<256x128xf32>
    %c0_1 = arith.constant 0 : index
    %c0_2 = arith.constant 0 : index
    %1 = vector.load %arg2[%c0_1, %c0_2] : memref<1x128xf32, #tpu.memory_space<vmem>>, vector<1x128xf32>
    %2 = vector.broadcast %1 : vector<1x128xf32> to vector<256x128xf32>
    %3 = arith.addf %0, %2 : vector<256x128xf32>
    %cst = arith.constant dense<0xFF800000> : vector<256xf32>
    %4 = vector.multi_reduction <maximumf>, %3, %cst [1] : vector<256x128xf32> to vector<256xf32>
    %5 = vector.shape_cast %4 : vector<256xf32> to vector<256x1xf32>
    %6 = vector.broadcast %5 : vector<256x1xf32> to vector<256x128xf32>
    %7 = arith.subf %3, %6 : vector<256x128xf32>
    %8 = math.exp %7 : vector<256x128xf32>
    %cst_3 = arith.constant dense<0.000000e+00> : vector<256xf32>
    %9 = vector.multi_reduction <add>, %8, %cst_3 [1] : vector<256x128xf32> to vector<256xf32>
    %10 = vector.shape_cast %9 : vector<256xf32> to vector<256x1xf32>
    %11 = math.log %10 : vector<256x1xf32>
    %12 = arith.addf %11, %5 : vector<256x1xf32>
    %c0_4 = arith.constant 0 : index
    %c0_5 = arith.constant 0 : index
    %13 = vector.load %arg3[%c0_4, %c0_5] : memref<256x1xf32, #tpu.memory_space<vmem>>, vector<256x1xf32>
    %14 = arith.subf %12, %13 : vector<256x1xf32>
    %c0_6 = arith.constant 0 : index
    %c0_7 = arith.constant 0 : index
    %15 = vector.load %arg4[%c0_6, %c0_7] : memref<256x1xf32, #tpu.memory_space<vmem>>, vector<256x1xf32>
    tpu.vector_store %arg4[%c0_6, %c0_7], %14 {strides = array<i32>} : memref<256x1xf32, #tpu.memory_space<vmem>>, vector<256x1xf32>,
    return
  }
  func.func @transform_0(%arg0: i32) -> (i32, i32) {
    %c0_i32 = arith.constant 0 : i32
    %c0_i32_0 = arith.constant 0 : i32
    return %arg0, %c0_i32 : i32, i32
  }
  func.func @transform_1(%arg0: i32) -> (i32, i32) {
    %c0_i32 = arith.constant 0 : i32
    %c0_i32_0 = arith.constant 0 : i32
    %c0_i32_1 = arith.constant 0 : i32
    return %c0_i32, %c0_i32_0 : i32, i32
  }
  func.func @transform_2(%arg0: i32) -> (i32, i32) {
    %c0_i32 = arith.constant 0 : i32
    %c0_i32_0 = arith.constant 0 : i32
    return %arg0, %c0_i32 : i32, i32
  }
  func.func @transform_3(%arg0: i32) -> (i32, i32) {
    %c0_i32 = arith.constant 0 : i32
    %c0_i32_0 = arith.constant 0 : i32
    return %arg0, %c0_i32 : i32, i32
  }
}

</mosaic_0001>

<bundles_post_ra>
// kernel: tpu_custom_call.1
= control target key start
LH: loop header
LB: loop body
LE: loop exit
PB: predicated region body
PF: predicated region fallthrough
CT: control target
= control target key end

     0   :  { %vm469_vm0 = vcmask 7168   ;;  %s1268_s0 = inlined_call_operand.vmem [shape: f32[256,128], index: 0, kind: input, shape index: {}]   ;;  %s1269_s1 = inlined_call_operand.vmem [shape: f32[1,128], index: 1, kind: input, shape index: {}]   ;;  %s1270_s2 = inlined_call_operand.vmem [shape: f32[256,1], index: 2, kind: input, shape index: {}]   ;;  %s1271_s3 = inlined_call_operand.vmem [shape: f32[256,1], index: 3, kind: output, shape index: {}]  }
   0x1   :  { %v14_v0 = vld [vmem:[%s1268_s0] sm:$0xff]  ;;  %v16_v2 = vld [vmem:[%s1268_s0 + $0x10] sm:$0xff]  ;;  %v15_v5 = vld [vmem:[%s1268_s0 + $0x8] sm:$0xff] }
   0x2   :  { %v661_v1 = vld [vmem:[%s1269_s1] ss:$0 sm:$0xff]  ;;  %v17_v6 = vld [vmem:[%s1268_s0 + $0x18] sm:$0xff]  ;;  %v19_v10 = vld [vmem:[%s1268_s0 + $0x28] sm:$0xff] }
   0x3   :  { %v667_v3 = vadd.f32 %v661_v1, %v14_v0  ;;  %v670_v4 = vadd.f32 %v661_v1, %v16_v2  ;;  %v681_v7 = vadd.f32 %v661_v1, %v15_v5  ;;  %v684_v8 = vadd.f32 %v661_v1, %v17_v6  ;;  %v18_v9 = vld [vmem:[%s1268_s0 + $0x20] sm:$0xff]  ;;  %v20_v13 = vld [vmem:[%s1268_s0 + $0x30] sm:$0xff]  ;;  %v21_v14 = vld [vmem:[%s1268_s0 + $0x38] sm:$0xff] }
   0x4   :  { %v695_v11 = vadd.f32 %v661_v1, %v18_v9  ;;  %v698_v12 = vadd.f32 %v661_v1, %v19_v10  ;;  %v709_v15 = vadd.f32 %v661_v1, %v20_v13  ;;  %v712_v16 = vadd.f32 %v661_v1, %v21_v14  ;;  %v22_v17 = vld [vmem:[%s1268_s0 + $0x40] sm:$0xff]  ;;  %v23_v18 = vld [vmem:[%s1268_s0 + $0x48] sm:$0xff]  ;;  %v24_v21 = vld [vmem:[%s1268_s0 + $0x50] sm:$0xff] }
   0x5   :  { %85 = vmax.xlane.f32.xlu0 %v667_v3  ;;  %89 = vmax.xlane.f32.xlu1 %v670_v4  ;;  %v723_v19 = vadd.f32 %v661_v1, %v22_v17  ;;  %v726_v20 = vadd.f32 %v661_v1, %v23_v18  ;;  %v25_v22 = vld [vmem:[%s1268_s0 + $0x58] sm:$0xff]  ;;  %v737_v23 = vadd.f32 %v661_v1, %v24_v21  ;;  %v26_v25 = vld [vmem:[%s1268_s0 + $0x60] sm:$0xff]  ;;  %v27_v26 = vld [vmem:[%s1268_s0 + $0x68] sm:$0xff] }
   0x6   :  { %v740_v24 = vadd.f32 %v661_v1, %v25_v22  ;;  %v751_v27 = vadd.f32 %v661_v1, %v26_v25  ;;  %v754_v28 = vadd.f32 %v661_v1, %v27_v26  ;;  %v28_v29 = vld [vmem:[%s1268_s0 + $0x70] sm:$0xff]  ;;  %v29_v30 = vld [vmem:[%s1268_s0 + $0x78] sm:$0xff]  ;;  %v30_v33 = vld [vmem:[%s1268_s0 + $0x80] sm:$0xff] }
   0x7   :  { %v765_v31 = vadd.f32 %v661_v1, %v28_v29  ;;  %v768_v32 = vadd.f32 %v661_v1, %v29_v30  ;;  %v31_v34 = vld [vmem:[%s1268_s0 + $0x88] sm:$0xff]  ;;  %v779_v35 = vadd.f32 %v661_v1, %v30_v33  ;;  %v32_v37 = vld [vmem:[%s1268_s0 + $0x90] sm:$0xff]  ;;  %v33_v38 = vld [vmem:[%s1268_s0 + $0x98] sm:$0xff] }
   0x8   :  { %v782_v36 = vadd.f32 %v661_v1, %v31_v34  ;;  %v793_v39 = vadd.f32 %v661_v1, %v32_v37  ;;  %v796_v40 = vadd.f32 %v661_v1, %v33_v38  ;;  %v34_v41 = vld [vmem:[%s1268_s0 + $0xa0] sm:$0xff]  ;;  %v35_v42 = vld [vmem:[%s1268_s0 + $0xa8] sm:$0xff]  ;;  %v36_v45 = vld [vmem:[%s1268_s0 + $0xb0] sm:$0xff] }
   0x9   :  { %87 = vmax.xlane.f32.xlu0 %v681_v7  ;;  %91 = vmax.xlane.f32.xlu1 %v684_v8  ;;  %v807_v43 = vadd.f32 %v661_v1, %v34_v41  ;;  %v810_v44 = vadd.f32 %v661_v1, %v35_v42  ;;  %v37_v46 = vld [vmem:[%s1268_s0 + $0xb8] sm:$0xff]  ;;  %v821_v47 = vadd.f32 %v661_v1, %v36_v45  ;;  %v38_v49 = vld [vmem:[%s1268_s0 + $0xc0] sm:$0xff]  ;;  %v39_v50 = vld [vmem:[%s1268_s0 + $0xc8] sm:$0xff] }
   0xa   :  { %v824_v48 = vadd.f32 %v661_v1, %v37_v46  ;;  %v835_v51 = vadd.f32 %v661_v1, %v38_v49  ;;  %v838_v52 = vadd.f32 %v661_v1, %v39_v50  ;;  %v40_v53 = vld [vmem:[%s1268_s0 + $0xd0] sm:$0xff]  ;;  %v41_v54 = vld [vmem:[%s1268_s0 + $0xd8] sm:$0xff]  ;;  %v42_v57 = vld [vmem:[%s1268_s0 + $0xe0] sm:$0xff] }
   0xb   :  { %v849_v55 = vadd.f32 %v661_v1, %v40_v53  ;;  %v852_v56 = vadd.f32 %v661_v1, %v41_v54  ;;  %v43_v58 = vld [vmem:[%s1268_s0 + $0xe8] sm:$0xff]  ;;  %v863_v59 = vadd.f32 %v661_v1, %v42_v57  ;;  %v44_v61 = vld [vmem:[%s1268_s0 + $0xf0] sm:$0xff]  ;;  %v45_v62 = vld [vmem:[%s1268_s0 + $0xf8] sm:$0xff] }
   0xc   :  { %v866_v60 = vadd.f32 %v661_v1, %v43_v58  ;;  %v877_v63 = vadd.f32 %v661_v1, %v44_v61  ;;  %v880_v0 = vadd.f32 %v661_v1, %v45_v62 }
   0xd   :  { %93 = vmax.xlane.f32.xlu0 %v695_v11  ;;  %95 = vmax.xlane.f32.xlu1 %v698_v12 }
  0x11   :  { %97 = vmax.xlane.f32.xlu0 %v709_v15  ;;  %99 = vmax.xlane.f32.xlu1 %v712_v16 }
  0x15   :  { %101 = vmax.xlane.f32.xlu0 %v723_v19  ;;  %103 = vmax.xlane.f32.xlu1 %v726_v20 }
  0x19   :  { %105 = vmax.xlane.f32.xlu0 %v737_v23  ;;  %107 = vmax.xlane.f32.xlu1 %v740_v24 }
  0x1d   :  { %109 = vmax.xlane.f32.xlu0 %v751_v27  ;;  %111 = vmax.xlane.f32.xlu1 %v754_v28 }
  0x21   :  { %113 = vmax.xlane.f32.xlu0 %v765_v31  ;;  %115 = vmax.xlane.f32.xlu1 %v768_v32 }
  0x25   :  { %117 = vmax.xlane.f32.xlu0 %v779_v35  ;;  %119 = vmax.xlane.f32.xlu1 %v782_v36 }
  0x29   :  { %121 = vmax.xlane.f32.xlu0 %v793_v39  ;;  %123 = vmax.xlane.f32.xlu1 %v796_v40 }
  0x2d   :  { %125 = vmax.xlane.f32.xlu0 %v807_v43  ;;  %127 = vmax.xlane.f32.xlu1 %v810_v44 }
  0x31   :  { %129 = vmax.xlane.f32.xlu0 %v821_v47  ;;  %131 = vmax.xlane.f32.xlu1 %v824_v48 }
  0x35   :  { %133 = vmax.xlane.f32.xlu0 %v835_v51  ;;  %135 = vmax.xlane.f32.xlu1 %v838_v52 }
  0x39   :  { %137 = vmax.xlane.f32.xlu0 %v849_v55  ;;  %139 = vmax.xlane.f32.xlu1 %v852_v56 }
  0x3d   :  { %141 = vmax.xlane.f32.xlu0 %v863_v59  ;;  %143 = vmax.xlane.f32.xlu1 %v866_v60 }
  0x41   :  { %145 = vmax.xlane.f32.xlu0 %v877_v63  ;;  %147 = vmax.xlane.f32.xlu1 %v880_v0 }
  0x8e   :  { %v884_v2 = vpop.xlane.xlu0 %85  ;;  %v886_v5 = vpop.xlane.xlu1 %89 }
  0x8f   :  { %v149_v6 = vsub.f32 %v667_v3, %v884_v2  ;;  %v151_v9 = vsub.f32 %v670_v4, %v886_v5 }
  0x91   :  { %v181_v10 = vmul.f32 1.442695, %v149_v6  ;;  %v185_v13 = vmul.f32 1.442695, %v151_v9 }
  0x92   :  { %v892_v14 = vpop.xlane.xlu0 %87  ;;  %v894_v1 = vpop.xlane.xlu1 %91 }
  0x93   :  { %507 = vpow2.f32 %v181_v10  ;;  %v150_v17 = vsub.f32 %v681_v7, %v892_v14  ;;  %v152_v18 = vsub.f32 %v684_v8, %v894_v1 }
  0x94   :  { %509 = vpow2.f32 %v185_v13 }
  0x95   :  { %v183_v21 = vmul.f32 1.442695, %v150_v17  ;;  %v187_v22 = vmul.f32 1.442695, %v152_v18 }
  0x96   :  { %v900_v3 = vpop.xlane.xlu0 %93  ;;  %v902_v25 = vpop.xlane.xlu1 %95 }
  0x97   :  { %511 = vpow2.f32 %v183_v21  ;;  %v153_v4 = vsub.f32 %v695_v11, %v900_v3  ;;  %v154_v26 = vsub.f32 %v698_v12, %v902_v25 }
  0x98   :  { %513 = vpow2.f32 %v187_v22 }
  0x99   :  { %v189_v29 = vmul.f32 1.442695, %v153_v4  ;;  %v191_v7 = vmul.f32 1.442695, %v154_v26 }
  0x9a   :  { %v908_v30 = vpop.xlane.xlu0 %97  ;;  %v910_v8 = vpop.xlane.xlu1 %99 }
  0x9b   :  { %515 = vpow2.f32 %v189_v29  ;;  %v155_v33 = vsub.f32 %v709_v15, %v908_v30  ;;  %v156_v34 = vsub.f32 %v712_v16, %v910_v8 }
  0x9c   :  { %517 = vpow2.f32 %v191_v7 }
  0x9d   :  { %v193_v37 = vmul.f32 1.442695, %v155_v33  ;;  %v195_v11 = vmul.f32 1.442695, %v156_v34 }
  0x9e   :  { %v916_v38 = vpop.xlane.xlu0 %101  ;;  %v918_v12 = vpop.xlane.xlu1 %103 }
  0x9f   :  { %519 = vpow2.f32 %v193_v37  ;;  %v157_v41 = vsub.f32 %v723_v19, %v916_v38  ;;  %v158_v42 = vsub.f32 %v726_v20, %v918_v12 }
  0xa0   :  { %v508_v45 = vpop.eup %507  ;;  %521 = vpow2.f32 %v195_v11 }
  0xa1   :  { %v197_v15 = vmul.f32 1.442695, %v157_v41  ;;  %245 = vadd.xlane.f32.xlu0 %v508_v45  ;;  %v199_v46 = vmul.f32 1.442695, %v158_v42  ;;  %v510_v16 = vpop.eup %509 }
  0xa2   :  { %v924_v49 = vpop.xlane.xlu0 %105  ;;  %v926_v50 = vpop.xlane.xlu1 %107 }
  0xa3   :  { %523 = vpow2.f32 %v197_v15  ;;  %v159_v53 = vsub.f32 %v737_v23, %v924_v49  ;;  %v160_v19 = vsub.f32 %v740_v24, %v926_v50 }
  0xa4   :  { %v512_v54 = vpop.eup %511  ;;  %525 = vpow2.f32 %v199_v46 }
  0xa5   :  { %v201_v20 = vmul.f32 1.442695, %v159_v53  ;;  %249 = vadd.xlane.f32.xlu0 %v510_v16  ;;  %247 = vadd.xlane.f32.xlu1 %v512_v54  ;;  %v203_v57 = vmul.f32 1.442695, %v160_v19  ;;  %v514_v58 = vpop.eup %513 }
  0xa6   :  { %v932_v61 = vpop.xlane.xlu0 %109  ;;  %v934_v62 = vpop.xlane.xlu1 %111 }
  0xa7   :  { %527 = vpow2.f32 %v201_v20  ;;  %v161_v6 = vsub.f32 %v751_v27, %v932_v61  ;;  %v162_v23 = vsub.f32 %v754_v28, %v934_v62 }
  0xa8   :  { %v516_v9 = vpop.eup %515  ;;  %529 = vpow2.f32 %v203_v57 }
  0xa9   :  { %v205_v24 = vmul.f32 1.442695, %v161_v6  ;;  %251 = vadd.xlane.f32.xlu1 %v514_v58  ;;  %253 = vadd.xlane.f32.xlu0 %v516_v9  ;;  %v207_v10 = vmul.f32 1.442695, %v162_v23  ;;  %v518_v13 = vpop.eup %517 }
  0xaa   :  { %v940_v17 = vpop.xlane.xlu0 %113  ;;  %v942_v18 = vpop.xlane.xlu1 %115 }
  0xab   :  { %531 = vpow2.f32 %v205_v24  ;;  %v163_v21 = vsub.f32 %v765_v31, %v940_v17  ;;  %v164_v27 = vsub.f32 %v768_v32, %v942_v18 }
  0xac   :  { %v520_v22 = vpop.eup %519  ;;  %533 = vpow2.f32 %v207_v10 }
  0xad   :  { %v209_v28 = vmul.f32 1.442695, %v163_v21  ;;  %255 = vadd.xlane.f32.xlu1 %v518_v13  ;;  %257 = vadd.xlane.f32.xlu0 %v520_v22  ;;  %v211_v4 = vmul.f32 1.442695, %v164_v27  ;;  %v522_v26 = vpop.eup %521 }
  0xae   :  { %v948_v29 = vpop.xlane.xlu0 %117  ;;  %v950_v7 = vpop.xlane.xlu1 %119 }
  0xaf   :  { %535 = vpow2.f32 %v209_v28  ;;  %v165_v33 = vsub.f32 %v779_v35, %v948_v29  ;;  %v166_v31 = vsub.f32 %v782_v36, %v950_v7 }
  0xb0   :  { %v524_v34 = vpop.eup %523  ;;  %537 = vpow2.f32 %v211_v4 }
  0xb1   :  { %v213_v32 = vmul.f32 1.442695, %v165_v33  ;;  %259 = vadd.xlane.f32.xlu1 %v522_v26  ;;  %261 = vadd.xlane.f32.xlu0 %v524_v34  ;;  %v215_v37 = vmul.f32 1.442695, %v166_v31  ;;  %v526_v11 = vpop.eup %525 }
  0xb2   :  { %v956_v41 = vpop.xlane.xlu0 %121  ;;  %v958_v42 = vpop.xlane.xlu1 %123 }
  0xb3   :  { %539 = vpow2.f32 %v213_v32  ;;  %v167_v45 = vsub.f32 %v793_v39, %v956_v41  ;;  %v168_v35 = vsub.f32 %v796_v40, %v958_v42 }
  0xb4   :  { %v528_v15 = vpop.eup %527  ;;  %541 = vpow2.f32 %v215_v37 }
  0xb5   :  { %v217_v36 = vmul.f32 1.442695, %v167_v45  ;;  %263 = vadd.xlane.f32.xlu1 %v526_v11  ;;  %265 = vadd.xlane.f32.xlu0 %v528_v15  ;;  %v219_v46 = vmul.f32 1.442695, %v168_v35  ;;  %v530_v16 = vpop.eup %529 }
  0xb6   :  { %v964_v53 = vpop.xlane.xlu0 %125  ;;  %v966_v19 = vpop.xlane.xlu1 %127 }
  0xb7   :  { %543 = vpow2.f32 %v217_v36  ;;  %v169_v54 = vsub.f32 %v807_v43, %v964_v53  ;;  %v170_v39 = vsub.f32 %v810_v44, %v966_v19 }
  0xb8   :  { %v532_v20 = vpop.eup %531  ;;  %545 = vpow2.f32 %v219_v46 }
  0xb9   :  { %v221_v40 = vmul.f32 1.442695, %v169_v54  ;;  %267 = vadd.xlane.f32.xlu1 %v530_v16  ;;  %269 = vadd.xlane.f32.xlu0 %v532_v20  ;;  %v223_v57 = vmul.f32 1.442695, %v170_v39  ;;  %v534_v58 = vpop.eup %533 }
  0xba   :  { %v972_v6 = vpop.xlane.xlu0 %129  ;;  %v974_v23 = vpop.xlane.xlu1 %131 }
  0xbb   :  { %547 = vpow2.f32 %v221_v40  ;;  %v171_v9 = vsub.f32 %v821_v47, %v972_v6  ;;  %v172_v43 = vsub.f32 %v824_v48, %v974_v23 }
  0xbc   :  { %v536_v24 = vpop.eup %535  ;;  %549 = vpow2.f32 %v223_v57 }
  0xbd   :  { %v225_v44 = vmul.f32 1.442695, %v171_v9  ;;  %271 = vadd.xlane.f32.xlu1 %v534_v58  ;;  %273 = vadd.xlane.f32.xlu0 %v536_v24  ;;  %v227_v10 = vmul.f32 1.442695, %v172_v43  ;;  %v538_v13 = vpop.eup %537 }
  0xbe   :  { %v980_v21 = vpop.xlane.xlu0 %133  ;;  %v982_v27 = vpop.xlane.xlu1 %135 }
  0xbf   :  { %551 = vpow2.f32 %v225_v44  ;;  %v173_v22 = vsub.f32 %v835_v51, %v980_v21  ;;  %v174_v47 = vsub.f32 %v838_v52, %v982_v27 }
  0xc0   :  { %v540_v28 = vpop.eup %539  ;;  %553 = vpow2.f32 %v227_v10 }
  0xc1   :  { %v229_v48 = vmul.f32 1.442695, %v173_v22  ;;  %275 = vadd.xlane.f32.xlu1 %v538_v13  ;;  %277 = vadd.xlane.f32.xlu0 %v540_v28  ;;  %v231_v4 = vmul.f32 1.442695, %v174_v47  ;;  %v542_v26 = vpop.eup %541 }
  0xc2   :  { %v988_v33 = vpop.xlane.xlu0 %137  ;;  %v990_v31 = vpop.xlane.xlu1 %139 }
  0xc3   :  { %555 = vpow2.f32 %v229_v48  ;;  %v175_v34 = vsub.f32 %v849_v55, %v988_v33  ;;  %v176_v51 = vsub.f32 %v852_v56, %v990_v31 }
  0xc4   :  { %v544_v32 = vpop.eup %543  ;;  %557 = vpow2.f32 %v231_v4 }
  0xc5   :  { %v233_v52 = vmul.f32 1.442695, %v175_v34  ;;  %279 = vadd.xlane.f32.xlu1 %v542_v26  ;;  %281 = vadd.xlane.f32.xlu0 %v544_v32  ;;  %v235_v37 = vmul.f32 1.442695, %v176_v51  ;;  %v546_v11 = vpop.eup %545 }
  0xc6   :  { %v996_v45 = vpop.xlane.xlu0 %141  ;;  %v998_v35 = vpop.xlane.xlu1 %143 }
  0xc7   :  { %559 = vpow2.f32 %v233_v52  ;;  %v177_v15 = vsub.f32 %v863_v59, %v996_v45  ;;  %v178_v55 = vsub.f32 %v866_v60, %v998_v35  ;;  %v405_v52 = vld [vmem:[%s1270_s2] sm:$0xff] }
  0xc8   :  { %v548_v36 = vpop.eup %547  ;;  %561 = vpow2.f32 %v235_v37 }
  0xc9   :  { %v237_v56 = vmul.f32 1.442695, %v177_v15  ;;  %283 = vadd.xlane.f32.xlu1 %v546_v11  ;;  %285 = vadd.xlane.f32.xlu0 %v548_v36  ;;  %v239_v46 = vmul.f32 1.442695, %v178_v55  ;;  %v550_v16 = vpop.eup %549 }
  0xca   :  { %v1004_v54 = vpop.xlane.xlu0 %145  ;;  %v1006_v39 = vpop.xlane.xlu1 %147 }
  0xcb   :  { %563 = vpow2.f32 %v237_v56  ;;  %v179_v20 = vsub.f32 %v877_v63, %v1004_v54  ;;  %v180_v59 = vsub.f32 %v880_v0, %v1006_v39 }
  0xcc   :  { %v552_v40 = vpop.eup %551  ;;  %565 = vpow2.f32 %v239_v46 }
  0xcd   :  { %v241_v60 = vmul.f32 1.442695, %v179_v20  ;;  %287 = vadd.xlane.f32.xlu1 %v550_v16  ;;  %289 = vadd.xlane.f32.xlu0 %v552_v40  ;;  %v243_v57 = vmul.f32 1.442695, %v180_v59  ;;  %v554_v58 = vpop.eup %553  ;;  %v406_v16 = vld [vmem:[%s1270_s2 + $0x8] sm:$0xff] }
  0xcf   :  { %567 = vpow2.f32 %v241_v60  ;;  %v407_v60 = vld [vmem:[%s1270_s2 + $0x10] sm:$0xff] }
  0xd0   :  { %v556_v9 = vpop.eup %555  ;;  %569 = vpow2.f32 %v243_v57 }
  0xd1   :  { %291 = vadd.xlane.f32.xlu1 %v554_v58  ;;  %293 = vadd.xlane.f32.xlu0 %v556_v9  ;;  %v558_v43 = vpop.eup %557 }
  0xd4   :  { %v560_v24 = vpop.eup %559 }
  0xd5   :  { %295 = vadd.xlane.f32.xlu1 %v558_v43  ;;  %297 = vadd.xlane.f32.xlu0 %v560_v24  ;;  %v562_v63 = vpop.eup %561 }
  0xd8   :  { %v564_v44 = vpop.eup %563 }
  0xd9   :  { %299 = vadd.xlane.f32.xlu1 %v562_v63  ;;  %301 = vadd.xlane.f32.xlu0 %v564_v44  ;;  %v566_v0 = vpop.eup %565  ;;  %v408_v44 = vld [vmem:[%s1270_s2 + $0x18] sm:$0xff] }
  0xdc   :  { %v568_v10 = vpop.eup %567 }
  0xdd   :  { %303 = vadd.xlane.f32.xlu1 %v566_v0  ;;  %305 = vadd.xlane.f32.xlu0 %v568_v10  ;;  %v570_v13 = vpop.eup %569 }
  0xe1   :  { %307 = vadd.xlane.f32.xlu1 %v570_v13 }
 0x12a   :  { %v246_v22 = vpop.xlane.xlu0 %245 }
 0x12b   :  { %571 = vlog2.f32 %v246_v22 }
 0x12e   :  { %v248_v47 = vpop.xlane.xlu1 %247  ;;  %v250_v28 = vpop.xlane.xlu0 %249 }
 0x12f   :  { %573 = vlog2.f32 %v248_v47 }
 0x130   :  { %575 = vlog2.f32 %v250_v28 }
 0x132   :  { %v252_v48 = vpop.xlane.xlu1 %251  ;;  %v254_v4 = vpop.xlane.xlu0 %253 }
 0x133   :  { %577 = vlog2.f32 %v252_v48 }
 0x134   :  { %579 = vlog2.f32 %v254_v4 }
 0x136   :  { %v256_v26 = vpop.xlane.xlu1 %255  ;;  %v258_v34 = vpop.xlane.xlu0 %257 }
 0x137   :  { %581 = vlog2.f32 %v256_v26 }
 0x138   :  { %v572_v51 = vpop.eup %571  ;;  %583 = vlog2.f32 %v258_v34 }
 0x139   :  { %v310_v32 = vmul.f32 0.6931472, %v572_v51 }
 0x13a   :  { %v260_v37 = vpop.xlane.xlu1 %259  ;;  %v262_v11 = vpop.xlane.xlu0 %261 }
 0x13b   :  { %v373_v15 = vadd.f32 %v310_v32, %v884_v2  ;;  %585 = vlog2.f32 %v260_v37 }
 0x13c   :  { %v574_v55 = vpop.eup %573  ;;  %587 = vlog2.f32 %v262_v11 }
 0x13d   :  { %v576_v36 = vpop.eup %575  ;;  %v437_v56 = vsub.f32 %v373_v15, %v405_v52  ;;  %v312_v46 = vmul.f32 0.6931472, %v574_v55 }
 0x13e   :  { %v314_v20 = vmul.f32 0.6931472, %v576_v36  ;;  %v264_v59 = vpop.xlane.xlu1 %263  ;;  %v266_v40 = vpop.xlane.xlu0 %265 }
 0x13f   :  { %470 = vst.msk [vmem:[%s1271_s3] sm:$0xff] %vm469_vm0, %v437_v56  ;;  %v374_v2 = vadd.f32 %v312_v46, %v892_v14  ;;  %589 = vlog2.f32 %v264_v59 }
 0x140   :  { %v578_v57 = vpop.eup %577  ;;  %v375_v58 = vadd.f32 %v314_v20, %v886_v5  ;;  %591 = vlog2.f32 %v266_v40  ;;  %v409_v5 = vld [vmem:[%s1270_s2 + $0x20] sm:$0xff] }
 0x141   :  { %v580_v9 = vpop.eup %579  ;;  %v438_v43 = vsub.f32 %v374_v2, %v406_v16  ;;  %v316_v24 = vmul.f32 0.6931472, %v578_v57 }
 0x142   :  { %v439_v63 = vsub.f32 %v375_v58, %v407_v60  ;;  %v318_v0 = vmul.f32 0.6931472, %v580_v9  ;;  %v268_v10 = vpop.xlane.xlu1 %267  ;;  %v270_v14 = vpop.xlane.xlu0 %269 }
 0x143   :  { %471 = vst.msk [vmem:[%s1271_s3 + $0x8] sm:$0xff] %vm469_vm0, %v438_v43  ;;  %v376_v13 = vadd.f32 %v316_v24, %v894_v1  ;;  %593 = vlog2.f32 %v268_v10  ;;  %v410_v1 = vld [vmem:[%s1270_s2 + $0x28] sm:$0xff] }
 0x144   :  { %v582_v22 = vpop.eup %581  ;;  %472 = vst.msk [vmem:[%s1271_s3 + $0x10] sm:$0xff] %vm469_vm0, %v439_v63  ;;  %v377_v47 = vadd.f32 %v318_v0, %v900_v3  ;;  %595 = vlog2.f32 %v270_v14  ;;  %v411_v3 = vld [vmem:[%s1270_s2 + $0x30] sm:$0xff] }
 0x145   :  { %v584_v28 = vpop.eup %583  ;;  %v440_v48 = vsub.f32 %v376_v13, %v408_v44  ;;  %v320_v4 = vmul.f32 0.6931472, %v582_v22 }
 0x146   :  { %v441_v26 = vsub.f32 %v377_v47, %v409_v5  ;;  %v322_v34 = vmul.f32 0.6931472, %v584_v28  ;;  %v272_v51 = vpop.xlane.xlu1 %271  ;;  %v274_v32 = vpop.xlane.xlu0 %273 }
 0x147   :  { %473 = vst.msk [vmem:[%s1271_s3 + $0x18] sm:$0xff] %vm469_vm0, %v440_v48  ;;  %v378_v52 = vadd.f32 %v320_v4, %v902_v25  ;;  %597 = vlog2.f32 %v272_v51  ;;  %v412_v25 = vld [vmem:[%s1270_s2 + $0x38] sm:$0xff] }
 0x148   :  { %v586_v37 = vpop.eup %585  ;;  %474 = vst.msk [vmem:[%s1271_s3 + $0x20] sm:$0xff] %vm469_vm0, %v441_v26  ;;  %v379_v11 = vadd.f32 %v322_v34, %v908_v30  ;;  %599 = vlog2.f32 %v274_v32  ;;  %v413_v30 = vld [vmem:[%s1270_s2 + $0x40] sm:$0xff] }
 0x149   :  { %v588_v15 = vpop.eup %587  ;;  %v442_v55 = vsub.f32 %v378_v52, %v410_v1  ;;  %v324_v36 = vmul.f32 0.6931472, %v586_v37 }
 0x14a   :  { %v443_v56 = vsub.f32 %v379_v11, %v411_v3  ;;  %v326_v46 = vmul.f32 0.6931472, %v588_v15  ;;  %v276_v16 = vpop.xlane.xlu1 %275  ;;  %v278_v20 = vpop.xlane.xlu0 %277 }
 0x14b   :  { %475 = vst.msk [vmem:[%s1271_s3 + $0x28] sm:$0xff] %vm469_vm0, %v442_v55  ;;  %v380_v59 = vadd.f32 %v324_v36, %v910_v8  ;;  %601 = vlog2.f32 %v276_v16  ;;  %v414_v8 = vld [vmem:[%s1270_s2 + $0x48] sm:$0xff] }
 0x14c   :  { %v590_v40 = vpop.eup %589  ;;  %476 = vst.msk [vmem:[%s1271_s3 + $0x30] sm:$0xff] %vm469_vm0, %v443_v56  ;;  %v381_v2 = vadd.f32 %v326_v46, %v916_v38  ;;  %603 = vlog2.f32 %v278_v20  ;;  %v415_v38 = vld [vmem:[%s1270_s2 + $0x50] sm:$0xff] }
 0x14d   :  { %v592_v60 = vpop.eup %591  ;;  %v444_v57 = vsub.f32 %v380_v59, %v412_v25  ;;  %v328_v58 = vmul.f32 0.6931472, %v590_v40 }
 0x14e   :  { %v445_v9 = vsub.f32 %v381_v2, %v413_v30  ;;  %v330_v43 = vmul.f32 0.6931472, %v592_v60  ;;  %v280_v24 = vpop.xlane.xlu1 %279  ;;  %v282_v63 = vpop.xlane.xlu0 %281 }
 0x14f   :  { %477 = vst.msk [vmem:[%s1271_s3 + $0x38] sm:$0xff] %vm469_vm0, %v444_v57  ;;  %v382_v44 = vadd.f32 %v328_v58, %v918_v12  ;;  %605 = vlog2.f32 %v280_v24  ;;  %v416_v12 = vld [vmem:[%s1270_s2 + $0x58] sm:$0xff] }
 0x150   :  { %v594_v0 = vpop.eup %593  ;;  %478 = vst.msk [vmem:[%s1271_s3 + $0x40] sm:$0xff] %vm469_vm0, %v445_v9  ;;  %v383_v10 = vadd.f32 %v330_v43, %v924_v49  ;;  %607 = vlog2.f32 %v282_v63  ;;  %v417_v49 = vld [vmem:[%s1270_s2 + $0x60] sm:$0xff] }
 0x151   :  { %v596_v14 = vpop.eup %595  ;;  %v446_v13 = vsub.f32 %v382_v44, %v414_v8  ;;  %v332_v5 = vmul.f32 0.6931472, %v594_v0 }
 0x152   :  { %v447_v22 = vsub.f32 %v383_v10, %v415_v38  ;;  %v334_v47 = vmul.f32 0.6931472, %v596_v14  ;;  %v284_v28 = vpop.xlane.xlu1 %283  ;;  %v286_v48 = vpop.xlane.xlu0 %285 }
 0x153   :  { %479 = vst.msk [vmem:[%s1271_s3 + $0x48] sm:$0xff] %vm469_vm0, %v446_v13  ;;  %v384_v4 = vadd.f32 %v332_v5, %v926_v50  ;;  %609 = vlog2.f32 %v284_v28  ;;  %v418_v50 = vld [vmem:[%s1270_s2 + $0x68] sm:$0xff] }
 0x154   :  { %v598_v26 = vpop.eup %597  ;;  %480 = vst.msk [vmem:[%s1271_s3 + $0x50] sm:$0xff] %vm469_vm0, %v447_v22  ;;  %v385_v1 = vadd.f32 %v334_v47, %v932_v61  ;;  %611 = vlog2.f32 %v286_v48  ;;  %v419_v61 = vld [vmem:[%s1270_s2 + $0x70] sm:$0xff] }
 0x155   :  { %v600_v34 = vpop.eup %599  ;;  %v448_v51 = vsub.f32 %v384_v4, %v416_v12  ;;  %v336_v32 = vmul.f32 0.6931472, %v598_v26 }
 0x156   :  { %v449_v52 = vsub.f32 %v385_v1, %v417_v49  ;;  %v338_v3 = vmul.f32 0.6931472, %v600_v34  ;;  %v288_v37 = vpop.xlane.xlu1 %287  ;;  %v290_v11 = vpop.xlane.xlu0 %289 }
 0x157   :  { %481 = vst.msk [vmem:[%s1271_s3 + $0x58] sm:$0xff] %vm469_vm0, %v448_v51  ;;  %v386_v15 = vadd.f32 %v336_v32, %v934_v62  ;;  %613 = vlog2.f32 %v288_v37  ;;  %v420_v62 = vld [vmem:[%s1270_s2 + $0x78] sm:$0xff] }
 0x158   :  { %v602_v55 = vpop.eup %601  ;;  %482 = vst.msk [vmem:[%s1271_s3 + $0x60] sm:$0xff] %vm469_vm0, %v449_v52  ;;  %v387_v36 = vadd.f32 %v338_v3, %v940_v17  ;;  %615 = vlog2.f32 %v290_v11  ;;  %v421_v17 = vld [vmem:[%s1270_s2 + $0x80] sm:$0xff] }
 0x159   :  { %v604_v56 = vpop.eup %603  ;;  %v450_v25 = vsub.f32 %v386_v15, %v418_v50  ;;  %v340_v46 = vmul.f32 0.6931472, %v602_v55 }
 0x15a   :  { %v451_v16 = vsub.f32 %v387_v36, %v419_v61  ;;  %v342_v20 = vmul.f32 0.6931472, %v604_v56  ;;  %v292_v59 = vpop.xlane.xlu1 %291  ;;  %v294_v30 = vpop.xlane.xlu0 %293 }
 0x15b   :  { %483 = vst.msk [vmem:[%s1271_s3 + $0x68] sm:$0xff] %vm469_vm0, %v450_v25  ;;  %v388_v40 = vadd.f32 %v340_v46, %v942_v18  ;;  %617 = vlog2.f32 %v292_v59  ;;  %v422_v18 = vld [vmem:[%s1270_s2 + $0x88] sm:$0xff] }
 0x15c   :  { %v606_v2 = vpop.eup %605  ;;  %484 = vst.msk [vmem:[%s1271_s3 + $0x70] sm:$0xff] %vm469_vm0, %v451_v16  ;;  %v389_v60 = vadd.f32 %v342_v20, %v948_v29  ;;  %619 = vlog2.f32 %v294_v30  ;;  %v423_v29 = vld [vmem:[%s1270_s2 + $0x90] sm:$0xff] }
 0x15d   :  { %v608_v57 = vpop.eup %607  ;;  %v452_v58 = vsub.f32 %v388_v40, %v420_v62  ;;  %v344_v9 = vmul.f32 0.6931472, %v606_v2 }
 0x15e   :  { %v453_v8 = vsub.f32 %v389_v60, %v421_v17  ;;  %v346_v43 = vmul.f32 0.6931472, %v608_v57  ;;  %v296_v24 = vpop.xlane.xlu1 %295  ;;  %v298_v63 = vpop.xlane.xlu0 %297 }
 0x15f   :  { %485 = vst.msk [vmem:[%s1271_s3 + $0x78] sm:$0xff] %vm469_vm0, %v452_v58  ;;  %v390_v44 = vadd.f32 %v344_v9, %v950_v7  ;;  %621 = vlog2.f32 %v296_v24  ;;  %v424_v7 = vld [vmem:[%s1270_s2 + $0x98] sm:$0xff] }
 0x160   :  { %v610_v38 = vpop.eup %609  ;;  %486 = vst.msk [vmem:[%s1271_s3 + $0x80] sm:$0xff] %vm469_vm0, %v453_v8  ;;  %v391_v0 = vadd.f32 %v346_v43, %v956_v41  ;;  %623 = vlog2.f32 %v298_v63  ;;  %v425_v41 = vld [vmem:[%s1270_s2 + $0xa0] sm:$0xff] }
 0x161   :  { %v612_v10 = vpop.eup %611  ;;  %v454_v14 = vsub.f32 %v390_v44, %v422_v18  ;;  %v348_v13 = vmul.f32 0.6931472, %v610_v38 }
 0x162   :  { %v455_v5 = vsub.f32 %v391_v0, %v423_v29  ;;  %v350_v22 = vmul.f32 0.6931472, %v612_v10  ;;  %v300_v12 = vpop.xlane.xlu1 %299  ;;  %v302_v47 = vpop.xlane.xlu0 %301 }
 0x163   :  { %487 = vst.msk [vmem:[%s1271_s3 + $0x88] sm:$0xff] %vm469_vm0, %v454_v14  ;;  %v392_v28 = vadd.f32 %v348_v13, %v958_v42  ;;  %625 = vlog2.f32 %v300_v12  ;;  %v426_v42 = vld [vmem:[%s1270_s2 + $0xa8] sm:$0xff] }
 0x164   :  { %v614_v48 = vpop.eup %613  ;;  %488 = vst.msk [vmem:[%s1271_s3 + $0x90] sm:$0xff] %vm469_vm0, %v455_v5  ;;  %v393_v4 = vadd.f32 %v350_v22, %v964_v53  ;;  %627 = vlog2.f32 %v302_v47  ;;  %v427_v53 = vld [vmem:[%s1270_s2 + $0xb0] sm:$0xff]  ;;  %v436_v47 = vld [vmem:[%s1270_s2 + $0xf8] sm:$0xff] }
 0x165   :  { %v616_v49 = vpop.eup %615  ;;  %v456_v26 = vsub.f32 %v392_v28, %v424_v7  ;;  %v352_v1 = vmul.f32 0.6931472, %v614_v48 }
 0x166   :  { %v457_v34 = vsub.f32 %v393_v4, %v425_v41  ;;  %v354_v51 = vmul.f32 0.6931472, %v616_v49  ;;  %v304_v32 = vpop.xlane.xlu1 %303  ;;  %v306_v52 = vpop.xlane.xlu0 %305 }
 0x167   :  { %489 = vst.msk [vmem:[%s1271_s3 + $0x98] sm:$0xff] %vm469_vm0, %v456_v26  ;;  %v394_v50 = vadd.f32 %v352_v1, %v966_v19  ;;  %629 = vlog2.f32 %v304_v32  ;;  %v428_v19 = vld [vmem:[%s1270_s2 + $0xb8] sm:$0xff] }
 0x168   :  { %v618_v3 = vpop.eup %617  ;;  %490 = vst.msk [vmem:[%s1271_s3 + $0xa0] sm:$0xff] %vm469_vm0, %v457_v34  ;;  %v395_v37 = vadd.f32 %v354_v51, %v972_v6  ;;  %631 = vlog2.f32 %v306_v52  ;;  %v429_v6 = vld [vmem:[%s1270_s2 + $0xc0] sm:$0xff] }
 0x169   :  { %v620_v11 = vpop.eup %619  ;;  %v458_v15 = vsub.f32 %v394_v50, %v426_v42  ;;  %v356_v61 = vmul.f32 0.6931472, %v618_v3 }
 0x16a   :  { %v459_v55 = vsub.f32 %v395_v37, %v427_v53  ;;  %v358_v36 = vmul.f32 0.6931472, %v620_v11  ;;  %v308_v56 = vpop.xlane.xlu1 %307 }
 0x16b   :  { %491 = vst.msk [vmem:[%s1271_s3 + $0xa8] sm:$0xff] %vm469_vm0, %v458_v15  ;;  %v396_v25 = vadd.f32 %v356_v61, %v974_v23  ;;  %633 = vlog2.f32 %v308_v56  ;;  %v430_v23 = vld [vmem:[%s1270_s2 + $0xc8] sm:$0xff] }
 0x16c   :  { %v622_v46 = vpop.eup %621  ;;  %492 = vst.msk [vmem:[%s1271_s3 + $0xb0] sm:$0xff] %vm469_vm0, %v459_v55  ;;  %v397_v16 = vadd.f32 %v358_v36, %v980_v21  ;;  %v431_v21 = vld [vmem:[%s1270_s2 + $0xd0] sm:$0xff] }
 0x16d   :  { %v624_v62 = vpop.eup %623  ;;  %v460_v20 = vsub.f32 %v396_v25, %v428_v19  ;;  %v360_v59 = vmul.f32 0.6931472, %v622_v46 }
 0x16e   :  { %v461_v30 = vsub.f32 %v397_v16, %v429_v6  ;;  %v362_v40 = vmul.f32 0.6931472, %v624_v62 }
 0x16f   :  { %493 = vst.msk [vmem:[%s1271_s3 + $0xb8] sm:$0xff] %vm469_vm0, %v460_v20  ;;  %v398_v17 = vadd.f32 %v360_v59, %v982_v27  ;;  %v432_v27 = vld [vmem:[%s1270_s2 + $0xd8] sm:$0xff] }
 0x170   :  { %v626_v2 = vpop.eup %625  ;;  %494 = vst.msk [vmem:[%s1271_s3 + $0xc0] sm:$0xff] %vm469_vm0, %v461_v30  ;;  %v399_v60 = vadd.f32 %v362_v40, %v988_v33  ;;  %v433_v33 = vld [vmem:[%s1270_s2 + $0xe0] sm:$0xff] }
 0x171   :  { %v628_v57 = vpop.eup %627  ;;  %v462_v58 = vsub.f32 %v398_v17, %v430_v23  ;;  %v364_v9 = vmul.f32 0.6931472, %v626_v2 }
 0x172   :  { %v463_v8 = vsub.f32 %v399_v60, %v431_v21  ;;  %v366_v18 = vmul.f32 0.6931472, %v628_v57 }
 0x173   :  { %495 = vst.msk [vmem:[%s1271_s3 + $0xc8] sm:$0xff] %vm469_vm0, %v462_v58  ;;  %v400_v43 = vadd.f32 %v364_v9, %v990_v31  ;;  %v434_v31 = vld [vmem:[%s1270_s2 + $0xe8] sm:$0xff] }
 0x174   :  { %v630_v24 = vpop.eup %629  ;;  %496 = vst.msk [vmem:[%s1271_s3 + $0xd0] sm:$0xff] %vm469_vm0, %v463_v8  ;;  %v401_v63 = vadd.f32 %v366_v18, %v996_v45  ;;  %v435_v45 = vld [vmem:[%s1270_s2 + $0xf0] sm:$0xff] }
 0x175   :  { %v632_v44 = vpop.eup %631  ;;  %v464_v29 = vsub.f32 %v400_v43, %v432_v27  ;;  %v368_v38 = vmul.f32 0.6931472, %v630_v24 }
 0x176   :  { %v465_v0 = vsub.f32 %v401_v63, %v433_v33  ;;  %v370_v10 = vmul.f32 0.6931472, %v632_v44 }
 0x177   :  { %497 = vst.msk [vmem:[%s1271_s3 + $0xd8] sm:$0xff] %vm469_vm0, %v464_v29  ;;  %v402_v14 = vadd.f32 %v368_v38, %v998_v35 }
 0x178   :  { %v634_v13 = vpop.eup %633  ;;  %498 = vst.msk [vmem:[%s1271_s3 + $0xe0] sm:$0xff] %vm469_vm0, %v465_v0  ;;  %v403_v5 = vadd.f32 %v370_v10, %v1004_v54 }
 0x179   :  { %v466_v7 = vsub.f32 %v402_v14, %v434_v31  ;;  %v372_v22 = vmul.f32 0.6931472, %v634_v13 }
 0x17a   :  { %v467_v12 = vsub.f32 %v403_v5, %v435_v45 }
 0x17b   :  { %499 = vst.msk [vmem:[%s1271_s3 + $0xe8] sm:$0xff] %vm469_vm0, %v466_v7  ;;  %v404_v35 = vadd.f32 %v372_v22, %v1006_v39 }
 0x17c   :  { %500 = vst.msk [vmem:[%s1271_s3 + $0xf0] sm:$0xff] %vm469_vm0, %v467_v12 }
 0x17d   :  { %v468_v54 = vsub.f32 %v404_v35, %v436_v47 }
 0x17f   :  { %501 = vst.msk [vmem:[%s1271_s3 + $0xf8] sm:$0xff] %vm469_vm0, %v468_v54 }

</bundles_post_ra>
